<compile_context>
chip_gen: v6e
topology: v6e:2x2x1
jax: 0.10.0
libtpu: 0.0.40
codegen_flags: <defaults>
</compile_context>

<pallas_src>
import functools

import jax
import jax.numpy as jnp
from jax.experimental import pallas as pl
from jax.experimental.pallas import tpu as pltpu


def _round_up(x, m):
    return (x + m - 1) // m * m


# --------------------------------------------------------------------------
# Kernels
# --------------------------------------------------------------------------

def _hyper_kernel_bf16(x_ref, w_ref, out_ref):
    # x_ref:  (B, S+1)   bf16, resident (constant index_map -> fetched once)
    # w_ref:  (S+1, TK)  bf16, streamed weight tile (bias folded as last row)
    # out_ref:(B, TK)    f32 lane-dense output tile (no padded batch rows)
    out_ref[...] = jnp.dot(x_ref[...], w_ref[...],
                           preferred_element_type=jnp.float32)


def _hyper_kernel_quant(x_ref, wq_ref, scale_ref, out_ref):
    # wq_ref:    (S+1, TK) int8 / fp8 streamed weight tile
    # scale_ref: (1, TK)   f32 per-output-column dequant scale
    # Per-column scale commutes with the matmul, so dequant is applied to the
    # f32 accumulator (VPU multiply; VALU slot is otherwise idle here).
    w = wq_ref[...].astype(jnp.bfloat16)  # int8/fp8 values are exact in bf16
    acc = jnp.dot(x_ref[...], w, preferred_element_type=jnp.float32)
    out_ref[...] = acc * scale_ref[...]


# --------------------------------------------------------------------------
# One-time (parameter-load-time) layout / dtype prep
# --------------------------------------------------------------------------

def prepare_hyper_params(weight, bias, *, tk=None, weight_dtype=jnp.bfloat16,
                         vmem_tile_budget=32 * 1024 * 1024):
    """Prepare the Linear hypernetwork parameters for streaming.

    weight : (K, S) float32  -- PyTorch nn.Linear layout
    bias   : (K,)   float32
    tk     : K tile size (multiple of 128).  Default None = auto-size against
             `vmem_tile_budget` so modest K runs as a single grid step and
             large K streams in multi-MiB tiles.
    weight_dtype : stream dtype.  jnp.bfloat16 (default, faithful),
             jnp.int8 (v5e/v6e) or jnp.float8_e4m3fn (v7x) halve the dominant
             weight bytes but are a *precision reduction* on the generated
             conv kernels -- opt in explicitly.

    Returns (w_stream (S+1, K_pad), scale_row (1, K_pad) f32 or None, tk).
    The bias is folded in as the last contraction row; the forward pass
    appends a ones column to the sketch.
    """
    K, S = weight.shape
    S1 = S + 1
    K_pad = _round_up(K, 128)
    quantized = jnp.dtype(weight_dtype) != jnp.dtype(jnp.bfloat16)
    wbytes = jnp.dtype(weight_dtype).itemsize

    if tk is None:
        # Double-buffered per-K-column VMEM bytes:
        #   streamed weight (2 bufs) + f32 scale row (2 bufs, quant only)
        #   + f32 output tile (2 bufs, assume <= 8 batch rows).
        per_col = 2 * wbytes * S1
        per_col += (2 * 4) if quantized else 0
        per_col += 2 * 4 * 8
        tk = (vmem_tile_budget // per_col) // 128 * 128
        tk = max(128, min(tk, K_pad))
    else:
        tk = _round_up(min(tk, K_pad), 128)
    K_pad = _round_up(K_pad, tk)

    # Transpose + bias-fold + lane-pad happens ONCE at load time.
    w_aug = jnp.concatenate([weight.T, bias[None, :]], axis=0)          # (S1, K)
    w_aug = jnp.pad(w_aug, ((0, 0), (0, K_pad - K))).astype(jnp.float32)

    if not quantized:
        return w_aug.astype(jnp.bfloat16), None, tk

    if jnp.dtype(weight_dtype) == jnp.dtype(jnp.int8):
        qmax = 127.0
    elif jnp.dtype(weight_dtype) == jnp.dtype(jnp.float8_e4m3fn):
        qmax = 448.0
    else:
        raise ValueError(f"unsupported weight stream dtype: {weight_dtype}")

    col_amax = jnp.max(jnp.abs(w_aug), axis=0)                          # (K_pad,)
    scale = jnp.maximum(col_amax / qmax, 1e-30)
    wq = w_aug / scale[None, :]
    if jnp.dtype(weight_dtype) == jnp.dtype(jnp.int8):
        w_stream = jnp.clip(jnp.round(wq), -127.0, 127.0).astype(jnp.int8)
    else:
        w_stream = wq.astype(weight_dtype)
    return w_stream, scale[None, :].astype(jnp.float32), tk


# --------------------------------------------------------------------------
# Forward
# --------------------------------------------------------------------------

def conv_decoder_forward(sketch, w_stream, scale_row, *, c_out, c_in, kh, kw,
                         tk, vmem_limit_bytes=48 * 1024 * 1024):
    """Pallas implementation of ConvDecoder.forward(hyper_net, sketch).

    sketch   : (B, S) float32
    w_stream : (S+1, K_pad)  bf16 / int8 / fp8 (from prepare_hyper_params)
    scale_row: (1, K_pad) f32 or None
    returns  : (B, c_out, c_in, kh, kw) float32 generated conv kernels
    """
    B, S = sketch.shape
    S1, K_pad = w_stream.shape
    assert S1 == S + 1
    K = c_out * c_in * kh * kw
    assert K <= K_pad and K_pad % tk == 0
    nk = K_pad // tk

    # Ones column turns the folded bias row into a plain add; cast the tiny
    # sketch to bf16 once (MXU-native, accumulation stays f32).
    x = jnp.concatenate(
        [sketch, jnp.ones((B, 1), sketch.dtype)], axis=1).astype(jnp.bfloat16)

    quantized = scale_row is not None
    cost = pl.CostEstimate(
        flops=2 * B * S1 * K_pad,
        transcendentals=0,
        bytes_accessed=(x.size * 2                                   # sketch, fetched once
                        + w_stream.size * w_stream.dtype.itemsize    # weight stream
                        + (scale_row.size * 4 if quantized else 0)   # scale stream
                        + B * K_pad * 4),                            # f32 output
    )

    in_specs = [
        # Resident sketch: constant index_map -> DMA'd once, never re-fetched.
        # (Its footprint, 2*(S+1)*B bytes, is negligible; no need to shrink
        #  its buffering.)
        pl.BlockSpec((B, S1), lambda k: (0, 0)),
        # Weight tiles stream through VMEM, double-buffered by default.
        pl.BlockSpec((S1, tk), lambda k: (0, k)),
    ]
    operands = [x, w_stream]
    if quantized:
        in_specs.append(pl.BlockSpec((1, tk), lambda k: (0, k)))
        operands.append(scale_row)
        kernel = _hyper_kernel_quant
    else:
        kernel = _hyper_kernel_bf16

    flat = pl.pallas_call(
        kernel,
        out_shape=jax.ShapeDtypeStruct((B, K_pad), jnp.float32),
        grid_spec=pltpu.PrefetchScalarGridSpec(
            num_scalar_prefetch=0,
            grid=(nk,),
            in_specs=in_specs,
            # Batch dim equals the full array dim -> legal and no padded rows
            # are ever written; K dim stays lane-dense (multiple of 128).
            out_specs=pl.BlockSpec((B, tk), lambda k: (0, k)),
        ),
        compiler_params=pltpu.CompilerParams(
            dimension_semantics=("parallel",),
            vmem_limit_bytes=vmem_limit_bytes),
        cost_estimate=cost,
    )(*operands)

    # JAX glue: drop K padding, reshape to the conv-filter layout.
    return flat[:, :K].reshape(B, c_out, c_in, kh, kw)


# --------------------------------------------------------------------------
# Reference (mirrors the streamed-weight rounding / scaling of the kernel)
# --------------------------------------------------------------------------

def _reference_from_prepared(sketch, w_stream, scale_row, K):
    x = jnp.concatenate(
        [sketch, jnp.ones((sketch.shape[0], 1), sketch.dtype)], axis=1)
    x = x.astype(jnp.bfloat16).astype(jnp.float32)
    y = x @ w_stream.astype(jnp.float32)
    if scale_row is not None:
        y = y * scale_row
    return y[:, :K]


if __name__ == "__main__":
    # Small shapes consistent with the module: per-sample sketch embedding,
    # hypernetwork emits a 4->4 channel 3x3 conv kernel.
    B = 2
    S = 32
    C_OUT, C_IN, KH, KW = 4, 4, 3, 3
    K = C_OUT * C_IN * KH * KW          # 144 -> K_pad = 256 lanes

    key = jax.random.PRNGKey(0)
    k_sketch, k_w, k_b = jax.random.split(key, 3)
    sketch = jax.random.normal(k_sketch, (B, S), dtype=jnp.float32)
    # Synthetic hypernetwork parameters in PyTorch Linear layout (K, S).
    weight = jax.random.normal(k_w, (K, S), dtype=jnp.float32) * 0.05
    bias = jax.random.normal(k_b, (K,), dtype=jnp.float32) * 0.01

    # ---- default path: bf16 stream, auto tile -> single grid step here ----
    w_bf, sc_bf, tk_bf = prepare_hyper_params(weight, bias)
    fwd_bf = jax.jit(functools.partial(
        conv_decoder_forward, c_out=C_OUT, c_in=C_IN, kh=KH, kw=KW, tk=tk_bf))
    out_bf = jax.block_until_ready(fwd_bf(sketch, w_bf, sc_bf))
    ref_bf = _reference_from_prepared(sketch, w_bf, sc_bf, K).reshape(
        B, C_OUT, C_IN, KH, KW)
    assert out_bf.shape == (B, C_OUT, C_IN, KH, KW)
    assert jnp.allclose(out_bf, ref_bf, atol=1e-2, rtol=1e-2)

    # ---- opt-in int8 stream, small forced tile so the multi-step streaming
    #      grid (K_pad=256 -> grid=(2,)) is exercised as well --------------
    w_q, sc_q, tk_q = prepare_hyper_params(
        weight, bias, tk=128, weight_dtype=jnp.int8)
    fwd_q = jax.jit(functools.partial(
        conv_decoder_forward, c_out=C_OUT, c_in=C_IN, kh=KH, kw=KW, tk=tk_q))
    out_q = jax.block_until_ready(fwd_q(sketch, w_q, sc_q))
    ref_q = _reference_from_prepared(sketch, w_q, sc_q, K).reshape(
        B, C_OUT, C_IN, KH, KW)
    assert jnp.allclose(out_q, ref_q, atol=1e-2, rtol=1e-2)
    # The quantized stream should still approximate the exact f32 hypernet.
    ref_exact = (sketch @ weight.T + bias).reshape(B, C_OUT, C_IN, KH, KW)
    assert jnp.allclose(out_q, ref_exact, atol=5e-2, rtol=5e-2)

    print("KERNEL_OK")
</pallas_src>

<mosaic_0001>
module attributes {stable_mosaic.version = 11 : i64} {
  func.func @_hyper_kernel_bf16(%arg0: i32, %arg1: memref<2x33xbf16, #tpu.memory_space<vmem>>, %arg2: memref<33x256xbf16, #tpu.memory_space<vmem>>, %arg3: memref<2x256xf32, #tpu.memory_space<vmem>>) attributes {dimension_semantics = [#tpu.dimension_semantics<parallel>], iteration_bounds = array<i64: 1>, scalar_prefetch = 0 : i64, scratch_operands = 0 : i64, tpu.core_type = #tpu.core_type<tc>, window_params = [{pipeline_mode = #tpu.pipeline_mode<synchronous>, transform_indices = @transform_0, window_bounds = array<i64: 2, 33>}, {transform_indices = @transform_1, window_bounds = array<i64: 33, 256>}, {transform_indices = @transform_2, window_bounds = array<i64: 2, 256>}]} {
    %c0 = arith.constant 0 : index
    %c0_0 = arith.constant 0 : index
    %0 = vector.load %arg1[%c0, %c0_0] : memref<2x33xbf16, #tpu.memory_space<vmem>>, vector<2x33xbf16>
    %c0_1 = arith.constant 0 : index
    %c0_2 = arith.constant 0 : index
    %1 = vector.load %arg2[%c0_1, %c0_2] : memref<33x256xbf16, #tpu.memory_space<vmem>>, vector<33x256xbf16>
    %cst = arith.constant dense<0.000000e+00> : vector<2x256xf32>
    %2 = tpu.matmul %0, %1, %cst {dimension_numbers = #tpu.dot_dimension_numbers<[1], [0], [0], [1], [0, 0, 1, 1], [], []>} : vector<2x33xbf16>, vector<33x256xbf16>, vector<2x256xf32> -> vector<2x256xf32>
    %c0_3 = arith.constant 0 : index
    %c0_4 = arith.constant 0 : index
    %3 = vector.load %arg3[%c0_3, %c0_4] : memref<2x256xf32, #tpu.memory_space<vmem>>, vector<2x256xf32>
    tpu.vector_store %arg3[%c0_3, %c0_4], %2 {strides = array<i32>} : memref<2x256xf32, #tpu.memory_space<vmem>>, vector<2x256xf32>,
    return
  }
  func.func @transform_0(%arg0: i32) -> (i32, i32) {
    %c0_i32 = arith.constant 0 : i32
    %c0_i32_0 = arith.constant 0 : i32
    %c0_i32_1 = arith.constant 0 : i32
    return %c0_i32, %c0_i32_0 : i32, i32
  }
  func.func @transform_1(%arg0: i32) -> (i32, i32) {
    %c0_i32 = arith.constant 0 : i32
    %c0_i32_0 = arith.constant 0 : i32
    return %c0_i32, %arg0 : i32, i32
  }
  func.func @transform_2(%arg0: i32) -> (i32, i32) {
    %c0_i32 = arith.constant 0 : i32
    %c0_i32_0 = arith.constant 0 : i32
    return %c0_i32, %arg0 : i32, i32
  }
}

</mosaic_0001>

<bundles_post_ra>
// kernel: conv_decoder_forward.1
= control target key start
LH: loop header
LB: loop body
LE: loop exit
PB: predicated region body
PF: predicated region fallthrough
CT: control target
= control target key end

     0   :  { %7 = vsyncpa [#allocation3], 0  ;;  %s170_s9 = smov [#allocation2]   ;;  %s198_s0 = inlined_call_operand.vmem [shape: bf16[2,33], index: 0, kind: input, shape index: {}]   ;;  %s199_s1 = inlined_call_operand.hbm [shape: bf16[33,256], index: 1, kind: input, shape index: {}]   ;;  %s200_s2 = inlined_call_operand.vmem [shape: f32[2,256], index: 2, kind: output, shape index: {}]  }
   0x1   :  { %s15_s10 = sshll.u32 %s170_s9, 4  ;;  %s16_s10 = int_to_ptr.vmem [resolvable:$true] %s15_s10 }
   0x2   :  { %s156_s11 = scalar_lea.vmem %s16_s10, 640  ;;  %p161_p1 = scmp.lt.s32.totalorder %s16_s10, %s16_s10 }
   0x3   :  { %p157_p0 = scmp.ne.s32.totalorder %s16_s10, %s156_s11  ;;  %p162_p2 = scmp.lt.s32.totalorder %s156_s11, %s156_s11 }
   0x5   :  { %p163_p3 = por %p162_p2, %p161_p1 }
   0x7   :  { %p164_p4 = pnand %p163_p3, %p157_p0 }
   0x9   :  { %167 = shalt.err (!%p164_p4)
}
   0xa   :  { %s171_s12 = smov 128   ;;  %s172_s13 = smov 8  }
   0xb   :  { %21 = dma.hbm_to_vmem [thread:$0]  %s199_s1, 640, %s16_s10, [#allocation3], %s171_s12, %s171_s12, %s172_s13  }
   0xc   :  { %168 = dma.done.wait [#allocation3], 640  }
   0xd   :  { %169 = vsyncadd [#allocation3], 4294966656  ;;  %v173_v0 = vmov 0   ;;  %vm61_vm0 = vcmask 1040384   ;;  %v31_v1 = vld [vmem:[#allocation2 + $0x20] sm:$0x11] }
   0xe   :  { %102 = vmatprep.mubr.bf16.mxu0 %v173_v0  ;;  %v63_v2 = vsel %vm61_vm0, 65535, %v173_v0  ;;  %v133_v3 = vcombine.high %v31_v1, %v31_v1  ;;  %v132_v4 = vcombine.low %v31_v1, %v31_v1  ;;  %v142_v7 = vld [vmem:[#allocation2 + $0x14] ss:$8 sps:$4 sm:$0xff]   ;;  %v144_v8 = vld [vmem:[#allocation2 + $0x10] ss:$8 sps:$4 sm:$0xff]   ;;  %vm57_vm1 = vcmask 269312  }
   0xf   :  { %v145_v9 = vld [vmem:[#allocation2 + $0x4] ss:$8 sps:$4 sm:$0xff]   ;;  %v147_v10 = vld [vmem:[#allocation2] ss:$8 sps:$4 sm:$0xff]  }
  0x10   :  { %v68_v5 = vand.u32 %v133_v3, %v63_v2  ;;  %v65_v6 = vand.u32 %v132_v4, %v63_v2  ;;  %v26_v11 = vld [vmem:[%s198_s0] sm:$0x1] }
  0x12   :  { %80 = vmatprep.subr.bf16.mxu0 %v68_v5 }
  0x13   :  { %81 = vmatpush1.bf16.msra.mxu0 %v65_v6 }
  0x14   :  { %82 = vmatprep.subr.bf16.mxu0 %v142_v7 }
  0x17   :  { %83 = vmatpush1.bf16.msra.mxu0 %v144_v8 }
  0x18   :  { %84 = vmatprep.subr.bf16.mxu0 %v145_v9 }
  0x1b   :  { %85 = vmatpush1.bf16.msra.mxu0 %v147_v10 }
  0x1e   :  { %134 = vmatmul.mubr.msk.bf16.vlgmr.msra.gmra.mxu0 %vm57_vm1, %v26_v11 }
  0xde   :  { %v104_v12 = vpop.f32.mrf.mxu0 }
  0xe0   :  { %v106_v13 = vpop.f32.mrf.mxu0 }
  0xe1   :  { %v113_v14 = vcombine.low %v104_v12, %v106_v13 }
  0xe2   :  { %v108_v15 = vpop.f32.mrf.mxu0 }
  0xe3   :  { %135 = vst.sshfl [vmem:[%s200_s2] sm:$0x33 pattern:$0x76325410] %v113_v14 }
  0xe4   :  { %v109_v16 = vpop.f32.mrf.mxu0 }
  0xe5   :  { %127 = vsyncpa [#allocation3], 1 }

</bundles_post_ra>
